<compile_context>
chip_gen: v5e
topology: v5e:2x2
jax: 0.10.0
libtpu: 0.0.40
codegen_flags: <defaults>
</compile_context>

<pallas_src>
import functools
import math

import jax
import jax.numpy as jnp
from jax import lax
from jax.experimental import pallas as pl
from jax.experimental.pallas import tpu as pltpu


def attn_kernel(x_ref, w_ref, b_ref, o_ref, *, B, Sq, Sk, D):
    # Everything is fully resident in VMEM (single grid step).
    x = x_ref[...]        # (B*S, 3D)  packed [x1 | x2 | x3]
    w = w_ref[...]        # (3D, 3D)   blockdiag(wq^T, wk^T, wv^T)
    b = b_ref[...]        # (1, 3D)    packed [0 | 0 | bv]

    # One fused projection matmul: y = [x1@wq^T | x2@wk^T | x3@wv^T] + [0|0|bv]
    y = lax.dot_general(
        x, w,
        dimension_numbers=(((1,), (0,)), ((), ())),
        preferred_element_type=jnp.float32,
    ) + b                                             # (B*S, 3D)

    # Slice q/k/v out by lane offset and restore the (B, S, D) view
    # (S = one sublane tile -> layout-preserving reshape).
    q = y[:, 0:D].reshape(B, Sq, D)
    k = y[:, D:2 * D].reshape(B, Sk, D)
    v = y[:, 2 * D:3 * D].reshape(B, Sk, D)

    # Scores: batched over B, contracting the feature dim (no explicit K^T).
    s = lax.dot_general(
        q, k,
        dimension_numbers=(((2,), (2,)), ((0,), (0,))),
        preferred_element_type=jnp.float32,
    ) / math.sqrt(D)                                  # (B, Sq, Sk)

    # Numerically stable softmax along the last axis.
    m = jnp.max(s, axis=-1, keepdims=True)
    e = jnp.exp(s - m)
    p = e * pl.reciprocal(jnp.sum(e, axis=-1, keepdims=True), approx=False)

    # Attention output: batched over B, contracting Sk.
    o = lax.dot_general(
        p, v,
        dimension_numbers=(((2,), (1,)), ((0,), (0,))),
        preferred_element_type=jnp.float32,
    )                                                 # (B, Sq, D)

    o_ref[...] = o.astype(o_ref.dtype)


def attention_model(x1, x2, x3, wq, wk, wv, bv):
    B, Sq, D = x1.shape
    _, Sk, _ = x2.shape
    assert Sq == Sk, "fused-projection path packs q/k/v row-wise (needs Sq == Sk)"
    dtype = x1.dtype

    # --- Wrapper-side packing (built once in JAX, no in-kernel shuffles) ---
    # Activations: (B*S, 3D)
    xp = jnp.concatenate(
        [x1.reshape(B * Sq, D), x2.reshape(B * Sk, D), x3.reshape(B * Sk, D)],
        axis=1,
    )
    # Weights: block-diagonal (3D, 3D) with the torch (out,in) weights transposed.
    wp = jnp.zeros((3 * D, 3 * D), dtype)
    wp = wp.at[0:D, 0:D].set(wq.T)
    wp = wp.at[D:2 * D, D:2 * D].set(wk.T)
    wp = wp.at[2 * D:3 * D, 2 * D:3 * D].set(wv.T)
    # Bias row: only the value block carries a bias.
    bp = jnp.concatenate([jnp.zeros((2 * D,), dtype), bv]).reshape(1, 3 * D)

    vmem = lambda: pl.BlockSpec(memory_space=pltpu.MemorySpace.VMEM)

    kernel = functools.partial(attn_kernel, B=B, Sq=Sq, Sk=Sk, D=D)
    return pl.pallas_call(
        kernel,
        out_shape=jax.ShapeDtypeStruct((B, Sq, D), dtype),
        in_specs=[vmem(), vmem(), vmem()],
        out_specs=vmem(),
        compiler_params=pltpu.CompilerParams(vmem_limit_bytes=4 * 1024 * 1024),
    )(xp, wp, bp)


def reference(x1, x2, x3, wq, wk, wv, bv):
    v1 = x1 @ wq.T
    v2 = x2 @ wk.T
    v3 = (v1 @ jnp.swapaxes(v2, -2, -1)) / math.sqrt(v1.shape[-1])
    v4 = jax.nn.softmax(v3, axis=-1)
    v6 = x3 @ wv.T + bv          # Dropout2d(p=0.0) == identity
    return v4 @ v6


if __name__ == "__main__":
    # Small, consistent shapes: key_dim = query_dim = value_dim = D = 32
    B, Sq, Sk, D = 2, 8, 8, 32

    key = jax.random.PRNGKey(0)
    k1, k2, k3, kq, kk, kv, kb = jax.random.split(key, 7)

    x1 = jax.random.normal(k1, (B, Sq, D), dtype=jnp.float32)
    x2 = jax.random.normal(k2, (B, Sk, D), dtype=jnp.float32)
    x3 = jax.random.normal(k3, (B, Sk, D), dtype=jnp.float32)

    # Deterministic parameter init (torch.nn.Linear-style uniform bounds).
    bound = 1.0 / math.sqrt(D)
    wq = jax.random.uniform(kq, (D, D), jnp.float32, -bound, bound)
    wk = jax.random.uniform(kk, (D, D), jnp.float32, -bound, bound)
    wv = jax.random.uniform(kv, (D, D), jnp.float32, -bound, bound)
    bv = jax.random.uniform(kb, (D,), jnp.float32, -bound, bound)

    out = attention_model(x1, x2, x3, wq, wk, wv, bv)
    out = jax.block_until_ready(out)

    ref = reference(x1, x2, x3, wq, wk, wv, bv)
    assert out.shape == (B, Sq, D)
    assert jnp.allclose(out, ref, atol=1e-5, rtol=1e-5)

    print("KERNEL_OK")
</pallas_src>

<mosaic_0001>
module attributes {stable_mosaic.version = 11 : i64} {
  func.func @attn_kernel(%arg0: memref<16x96xf32, #tpu.memory_space<vmem>>, %arg1: memref<96x96xf32, #tpu.memory_space<vmem>>, %arg2: memref<1x96xf32, #tpu.memory_space<vmem>>, %arg3: memref<2x8x32xf32, #tpu.memory_space<vmem>>) attributes {dimension_semantics = [], scalar_prefetch = 0 : i64, scratch_operands = 0 : i64, tpu.core_type = #tpu.core_type<tc>} {
    %c0 = arith.constant 0 : index
    %c0_0 = arith.constant 0 : index
    %0 = vector.load %arg0[%c0, %c0_0] : memref<16x96xf32, #tpu.memory_space<vmem>>, vector<16x96xf32>
    %c0_1 = arith.constant 0 : index
    %c0_2 = arith.constant 0 : index
    %1 = vector.load %arg1[%c0_1, %c0_2] : memref<96x96xf32, #tpu.memory_space<vmem>>, vector<96x96xf32>
    %c0_3 = arith.constant 0 : index
    %c0_4 = arith.constant 0 : index
    %2 = vector.load %arg2[%c0_3, %c0_4] : memref<1x96xf32, #tpu.memory_space<vmem>>, vector<1x96xf32>
    %cst = arith.constant dense<0.000000e+00> : vector<16x96xf32>
    %3 = tpu.matmul %0, %1, %cst {dimension_numbers = #tpu.dot_dimension_numbers<[1], [0], [0], [1], [0, 0, 1, 1], [], []>} : vector<16x96xf32>, vector<96x96xf32>, vector<16x96xf32> -> vector<16x96xf32>
    %4 = vector.broadcast %2 : vector<1x96xf32> to vector<16x96xf32>
    %5 = arith.addf %3, %4 : vector<16x96xf32>
    %6 = vector.extract_strided_slice %5 {offsets = [0, 0], sizes = [16, 32], strides = [1, 1]} : vector<16x96xf32> to vector<16x32xf32>
    %7 = vector.shape_cast %6 : vector<16x32xf32> to vector<2x8x32xf32>
    %8 = vector.extract_strided_slice %5 {offsets = [0, 32], sizes = [16, 32], strides = [1, 1]} : vector<16x96xf32> to vector<16x32xf32>
    %9 = vector.shape_cast %8 : vector<16x32xf32> to vector<2x8x32xf32>
    %10 = vector.extract_strided_slice %5 {offsets = [0, 64], sizes = [16, 32], strides = [1, 1]} : vector<16x96xf32> to vector<16x32xf32>
    %11 = vector.shape_cast %10 : vector<16x32xf32> to vector<2x8x32xf32>
    %cst_5 = arith.constant dense<0.000000e+00> : vector<2x8x8xf32>
    %12 = tpu.matmul %7, %9, %cst_5 {dimension_numbers = #tpu.dot_dimension_numbers<[2], [2], [1], [1], [0, 0, 0, 1, 1, 1], [0], [0]>} : vector<2x8x32xf32>, vector<2x8x32xf32>, vector<2x8x8xf32> -> vector<2x8x8xf32>
    %cst_6 = arith.constant 5.65685415 : f32
    %13 = vector.broadcast %cst_6 : f32 to vector<2x8x8xf32>
    %14 = arith.divf %12, %13 : vector<2x8x8xf32>
    %cst_7 = arith.constant dense<0xFF800000> : vector<2x8xf32>
    %15 = vector.multi_reduction <maximumf>, %14, %cst_7 [2] : vector<2x8x8xf32> to vector<2x8xf32>
    %16 = vector.shape_cast %15 : vector<2x8xf32> to vector<2x8x1xf32>
    %17 = vector.broadcast %16 : vector<2x8x1xf32> to vector<2x8x8xf32>
    %18 = arith.subf %14, %17 : vector<2x8x8xf32>
    %19 = math.exp %18 : vector<2x8x8xf32>
    %cst_8 = arith.constant dense<0.000000e+00> : vector<2x8xf32>
    %20 = vector.multi_reduction <add>, %19, %cst_8 [2] : vector<2x8x8xf32> to vector<2x8xf32>
    %21 = vector.shape_cast %20 : vector<2x8xf32> to vector<2x8x1xf32>
    %22 = tpu.reciprocal %21 : vector<2x8x1xf32> -> vector<2x8x1xf32>
    %23 = vector.broadcast %22 : vector<2x8x1xf32> to vector<2x8x8xf32>
    %24 = arith.mulf %19, %23 : vector<2x8x8xf32>
    %cst_9 = arith.constant dense<0.000000e+00> : vector<2x8x32xf32>
    %25 = tpu.matmul %24, %11, %cst_9 {dimension_numbers = #tpu.dot_dimension_numbers<[2], [1], [1], [2], [0, 0, 0, 1, 1, 2], [0], [0]>} : vector<2x8x8xf32>, vector<2x8x32xf32>, vector<2x8x32xf32> -> vector<2x8x32xf32>
    %c0_10 = arith.constant 0 : index
    %c0_11 = arith.constant 0 : index
    %c0_12 = arith.constant 0 : index
    %26 = vector.load %arg3[%c0_10, %c0_11, %c0_12] : memref<2x8x32xf32, #tpu.memory_space<vmem>>, vector<2x8x32xf32>
    tpu.vector_store %arg3[%c0_10, %c0_11, %c0_12], %25 {strides = array<i32>} : memref<2x8x32xf32, #tpu.memory_space<vmem>>, vector<2x8x32xf32>,
    return
  }
}

</mosaic_0001>

<bundles_post_ra>
// kernel: tpu_custom_call.1
= control target key start
LH: loop header
LB: loop body
LE: loop exit
PB: predicated region body
PF: predicated region fallthrough
CT: control target
= control target key end

     0   :  { %8 = vsyncpa [#allocation3], 0  ;;  %s448_s0 = inlined_call_operand.hbm [shape: f32[16,96], index: 0, kind: input, shape index: {}]   ;;  %s449_s1 = inlined_call_operand.hbm [shape: f32[96,96], index: 1, kind: input, shape index: {}]   ;;  %s450_s2 = inlined_call_operand.vmem [shape: f32[1,96], index: 2, kind: input, shape index: {}]   ;;  %s451_s3 = inlined_call_operand.hbm [shape: f32[2,8,32], index: 3, kind: output, shape index: {}]  }
   0x1   :  { %9 = vsyncpa [#allocation6], 0 }
   0x2   :  { %10 = vsyncpa [#allocation4], 0  ;;  %s15_s14 = sshll.u32 %s448_s0, 4  ;;  %s387_s15 = smov [#allocation2]   ;;  %s16_s14 = int_to_ptr.hbm [resolvable:$true] %s15_s14 }
   0x3   :  { %s17_s16 = sshll.u32 %s387_s15, 4  ;;  %s28_s19 = sshll.u32 %s449_s1, 4  ;;  %s18_s16 = int_to_ptr.vmem [resolvable:$true] %s17_s16  ;;  %s29_s19 = int_to_ptr.hbm [resolvable:$true] %s28_s19 }
   0x4   :  { %s388_s20 = smov 128   ;;  %s389_s21 = smov 8  }
   0x5   :  { %23 = dma.hbm_to_vmem [thread:$0]  %s16_s14, 256, %s18_s16, [#allocation3], %s388_s20, %s388_s20, %s389_s21  }
   0x6   :  { %s390_s22 = smov [#allocation5]  }
   0x7   :  { %s30_s23 = sshll.u32 %s390_s22, 4  ;;  %s31_s23 = int_to_ptr.vmem [resolvable:$true] %s30_s23 }
   0x8   :  { %36 = dma.hbm_to_vmem [thread:$0]  %s29_s19, 1536, %s31_s23, [#allocation6], %s388_s20, %s388_s20, %s389_s21  }
   0x9   :  { %381 = dma.done.wait [#allocation3], 256  }
   0xa   :  { %382 = vsyncadd [#allocation3], 4294967040 }
   0xb   :  { %383 = dma.done.wait [#allocation6], 1536  }
   0xc   :  { %384 = vsyncadd [#allocation6], 4294965760  ;;  %v60_v0 = vld [vmem:[#allocation5 + $0x58] sm:$0xff]  ;;  %v59_v1 = vld [vmem:[#allocation5 + $0x50] sm:$0xff]  ;;  %vm65_vm0 = vcmask 785408   ;;  %s391_s24 = smov 96  }
   0xd   :  { %76 = vmatpush.msra.mxu0 %v60_v0  ;;  %v58_v2 = vld [vmem:[#allocation5 + $0x48] sm:$0xff]  ;;  %v57_v3 = vld [vmem:[#allocation5 + $0x40] sm:$0xff]  ;;  %v56_v4 = vld [vmem:[#allocation5 + $0x38] sm:$0xff]  ;;  %s392_s25 = smov 64   ;;  %vm98_vm1 = vcmask 261120   ;;  %vm159_vm3 = vcmask 64512  }
   0xe   :  { %v55_v5 = vld [vmem:[#allocation5 + $0x30] sm:$0xff]  ;;  %v54_v6 = vld [vmem:[#allocation5 + $0x28] sm:$0xff]  ;;  %v53_v7 = vld [vmem:[#allocation5 + $0x20] sm:$0xff]  ;;  %v393_v22 = vmov 5.656854   ;;  %s268_s29 = sshll.u32 %s451_s3, 4  ;;  %s269_s29 = int_to_ptr.hbm [resolvable:$true] %s268_s29 }
   0xf   :  { %77 = vmatpush.msra.mxu0 %v59_v1  ;;  %v52_v8 = vld [vmem:[#allocation5 + $0x18] sm:$0xff]  ;;  %v51_v9 = vld [vmem:[#allocation5 + $0x10] sm:$0xff]  ;;  %v50_v10 = vld [vmem:[#allocation5 + $0x8] sm:$0xff]  ;;  %299 = vrcp.f32 %v393_v22 }
  0x10   :  { %v49_v11 = vld [vmem:[#allocation5] sm:$0xff]  ;;  %v47_v12 = vld [vmem:[#allocation2] sm:$0xff]  ;;  %v48_v13 = vld [vmem:[#allocation2 + $0x8] sm:$0xff] }
  0x11   :  { %78 = vmatpush.msra.mxu0 %v58_v2  ;;  %v298_v14 = vld [vmem:[%s450_s2] ss:$0 sm:$0xff]  ;;  %s394_s2 = smov [#allocation7]  }
  0x12   :  { %s266_s26 = sshll.u32 %s394_s2, 4  ;;  %s267_s26 = int_to_ptr.vmem [resolvable:$true] %s266_s26 }
  0x13   :  { %79 = vmatpush.msra.mxu0 %v57_v3 }
  0x15   :  { %80 = vmatpush.msra.mxu0 %v56_v4  ;;  %v300_v23 = vpop.eup %299 }
  0x16   :  { %v151_v24 = vmul.f32 5.656854, %v300_v23  ;;  %vm155_vm2 = vweird.f32 %v300_v23 }
  0x17   :  { %81 = vmatpush.msra.mxu0 %v55_v5 }
  0x18   :  { %v152_v25 = vsub.f32 1.0, %v151_v24 }
  0x19   :  { %82 = vmatpush.msra.mxu0 %v54_v6 }
  0x1a   :  { %v153_v26 = vmul.f32 %v300_v23, %v152_v25 }
  0x1b   :  { %83 = vmatpush.msra.mxu0 %v53_v7 }
  0x1c   :  { %v154_v27 = vadd.f32 %v300_v23, %v153_v26 }
  0x1d   :  { %84 = vmatpush.msra.mxu0 %v52_v8 }
  0x1e   :  { %v156_v28 = vsel %vm155_vm2, %v300_v23, %v154_v27 }
  0x1f   :  { %85 = vmatpush.msra.mxu0 %v51_v9 }
  0x21   :  { %86 = vmatpush.msra.mxu0 %v50_v10 }
  0x23   :  { %87 = vmatpush.msra.mxu0 %v49_v11 }
  0x24   :  { %282 = vmatmul.msk.f32.vlgmr.msra.gmra.mxu0 %vm65_vm0, %v47_v12 }
  0x2c   :  { %283 = vmatmul.msk.f32.gmra.mxu0 %vm65_vm0, %v48_v13 }
  0xa1   :  { %v89_v15 = vpop.f32.mrf.mxu0 }
  0xa2   :  { %v90_v16 = vadd.f32 %v298_v14, %v89_v15 }
  0xa4   :  { %96 = vrot.lane.b32.xlu0 %v90_v16, %s391_s24 }
  0xa9   :  { %v92_v17 = vpop.f32.mrf.mxu0 }
  0xaa   :  { %v93_v18 = vadd.f32 %v298_v14, %v92_v17 }
  0xac   :  { %124 = vrot.lane.b32.xlu0 %v93_v18, %s391_s24 }
  0xb4   :  { %208 = vrot.lane.b32.xlu0 %v90_v16, %s392_s25 }
 0x116   :  { %v97_v19 = vpop.permute.xlu0 %96 }
 0x117   :  { %284 = vmatpush.xpose.msk.msra.mxu1 %vm98_vm1, %v97_v19 }
 0x11a   :  { %285 = vmatmul.msk.f32.vlgmr.msra.gmra.mxu1 %vm98_vm1, %v90_v16 }
 0x11e   :  { %v125_v20 = vpop.permute.xlu0 %124 }
 0x11f   :  { %286 = vmatpush.xpose.msk.msra.mxu2 %vm98_vm1, %v125_v20 }
 0x122   :  { %287 = vmatmul.msk.f32.vlgmr.msra.gmra.mxu2 %vm98_vm1, %v93_v18 }
 0x126   :  { %v209_v21 = vpop.permute.xlu0 %208 }
 0x127   :  { %229 = vmatpush.msra.mxu3 %v209_v21 }
 0x197   :  { %v120_v29 = vpop.f32.mrf.mxu1 }
 0x198   :  { %v157_v30 = vmul.f32 %v156_v28, %v120_v29 }
 0x19a   :  { %v160_v31 = vsel %vm159_vm3, %v157_v30, -inf }
 0x19b   :  { %161 = vmax.xlane.f32.xlu1 %v160_v31 }
 0x1a5   :  { %v147_v32 = vpop.f32.mrf.mxu2 }
 0x1a6   :  { %v158_v33 = vmul.f32 %v156_v28, %v147_v32 }
 0x1a8   :  { %v163_v34 = vsel %vm159_vm3, %v158_v33, -inf }
 0x1a9   :  { %164 = vmax.xlane.f32.xlu1 %v163_v34 }
 0x1c2   :  { %234 = vrot.lane.b32.xlu1 %v93_v18, %s392_s25 }
 0x20e   :  { %v162_v35 = vpop.xlane.xlu1 %161 }
 0x20f   :  { %v166_v36 = vsub.f32 %v157_v30, %v162_v35 }
 0x211   :  { %v168_v37 = vmul.f32 1.442695, %v166_v36 }
 0x213   :  { %301 = vpow2.f32 %v168_v37 }
 0x219   :  { %v302_v38 = vpop.eup %301 }
 0x21a   :  { %v172_v39 = vsel %vm159_vm3, %v302_v38, 0.0 }
 0x21b   :  { %173 = vadd.xlane.f32.xlu2 %v172_v39 }
 0x21c   :  { %v165_v40 = vpop.xlane.xlu1 %164 }
 0x21d   :  { %v167_v41 = vsub.f32 %v158_v33, %v165_v40 }
 0x21f   :  { %v170_v42 = vmul.f32 1.442695, %v167_v41 }
 0x221   :  { %303 = vpow2.f32 %v170_v42 }
 0x227   :  { %v304_v43 = vpop.eup %303 }
 0x228   :  { %v175_v44 = vsel %vm159_vm3, %v304_v43, 0.0 }
 0x229   :  { %176 = vadd.xlane.f32.xlu2 %v175_v44 }
 0x234   :  { %v235_v45 = vpop.permute.xlu1 %234 }
 0x235   :  { %255 = vmatpush.msrb.mxu3 %v235_v45 }
 0x28e   :  { %v174_v46 = vpop.xlane.xlu2 %173 }
 0x28f   :  { %305 = vrcp.f32 %v174_v46  ;;  %v189_v50 = vand.u32 2147483648, %v174_v46  ;;  %v187_v52 = vand.u32 2147483647, %v174_v46  ;;  %vm183_vm5 = vweird.f32 %v174_v46 }
 0x291   :  { %v190_v55 = vor.u32 1.1754944e-38, %v189_v50  ;;  %vm188_vm7 = vcmp.eq.f32.partialorder %v187_v52, 8.507059e+37 }
 0x295   :  { %v306_v47 = vpop.eup %305 }
 0x296   :  { %v179_v48 = vmul.f32 %v306_v47, %v174_v46  ;;  %vm184_vm4 = vweird.f32 %v306_v47 }
 0x297   :  { %vm185_vm6 = vmor %vm183_vm5, %vm184_vm4 }
 0x298   :  { %v180_v49 = vsub.f32 1.0, %v179_v48 }
 0x29a   :  { %v181_v51 = vmul.f32 %v306_v47, %v180_v49 }
 0x29c   :  { %v177_v53 = vpop.xlane.xlu2 %176  ;;  %v182_v54 = vadd.f32 %v306_v47, %v181_v51 }
 0x29d   :  { %307 = vrcp.f32 %v177_v53  ;;  %v203_v62 = vand.u32 2147483648, %v177_v53  ;;  %v201_v0 = vand.u32 2147483647, %v177_v53  ;;  %vm197_vm9 = vweird.f32 %v177_v53 }
 0x29e   :  { %v186_v56 = vsel %vm185_vm6, %v306_v47, %v182_v54 }
 0x29f   :  { %v191_v57 = vsel %vm188_vm7, %v190_v55, %v186_v56  ;;  %v204_v2 = vor.u32 1.1754944e-38, %v203_v62  ;;  %vm202_vm11 = vcmp.eq.f32.partialorder %v201_v0, 8.507059e+37 }
 0x2a0   :  { %v206_v58 = vmul.f32 %v302_v38, %v191_v57 }
 0x2a2   :  { %288 = vmatmul.msk.f32.vlgmr.msra.gmra.mxu3 %vm159_vm3, %v206_v58 }
 0x2a3   :  { %v308_v59 = vpop.eup %307 }
 0x2a4   :  { %v193_v60 = vmul.f32 %v308_v59, %v177_v53  ;;  %vm198_vm8 = vweird.f32 %v308_v59 }
 0x2a5   :  { %vm199_vm10 = vmor %vm197_vm9, %vm198_vm8 }
 0x2a6   :  { %v194_v61 = vsub.f32 1.0, %v193_v60 }
 0x2a8   :  { %v195_v63 = vmul.f32 %v308_v59, %v194_v61 }
 0x2aa   :  { %v196_v1 = vadd.f32 %v308_v59, %v195_v63 }
 0x2ac   :  { %v200_v3 = vsel %vm199_vm10, %v308_v59, %v196_v1 }
 0x2ad   :  { %v205_v4 = vsel %vm202_vm11, %v204_v2, %v200_v3 }
 0x2ae   :  { %v207_v5 = vmul.f32 %v304_v43, %v205_v4 }
 0x2b0   :  { %289 = vmatmul.msk.f32.vlgmr.msrb.gmra.mxu3 %vm159_vm3, %v207_v5 }
 0x325   :  { %v231_v6 = vpop.f32.mrf.mxu3 }
 0x326   :  { %260 = vst.msk [vmem:[#allocation7] sm:$0xff] %vm98_vm1, %v231_v6 }
 0x333   :  { %v257_v7 = vpop.f32.mrf.mxu3 }
 0x334   :  { %261 = vst.msk [vmem:[#allocation7 + $0x8] sm:$0xff] %vm98_vm1, %v257_v7 }
 0x335   :  { %274 = dma.vmem_to_hbm [thread:$0]  %s267_s26, 256, %s269_s29, [#allocation4], %s388_s20, %s388_s20, %s389_s21  }
 0x336   :  { %385 = dma.done.wait [#allocation4], 256  }
 0x337   :  { %386 = vsyncadd [#allocation4], 4294967040 }
 0x338   :  { %279 = vsyncpa [#allocation3], 1 }
 0x339   :  { %280 = vsyncpa [#allocation6], 1 }
 0x33a   :  { %281 = vsyncpa [#allocation4], 1 }

</bundles_post_ra>
